<compile_context>
chip_gen: v6e
topology: v6e:2x2x1
jax: 0.10.0
libtpu: 0.0.40
codegen_flags: <defaults>
</compile_context>

<pallas_src>
import functools

import jax
import jax.numpy as jnp
from jax.experimental import pallas as pl
from jax.experimental.pallas import tpu as pltpu

BN_EPS = 1e-5
LRELU_SLOPE = 0.1
LANE = 128          # TPU vreg lane width
ROW_ALIGN = 16      # bf16 sublane packing is (16, 128)
TILE_N_MAX = 512    # batch rows per grid step (safe for v7x 64 MiB VMEM; raise on v5e/v6e)


def _round_up(x, m):
    return (x + m - 1) // m * m


def _pad2d(a, rows, cols):
    return jnp.pad(a, ((0, rows - a.shape[0]), (0, cols - a.shape[1])))


def _leaky_relu(x):
    return jnp.where(x >= 0, x, LRELU_SLOPE * x)


def _col_stats_block(h):
    """Per-tile column sum / sum-of-squares packed into one lane-dense (8, H) block."""
    s = jnp.sum(h, axis=0, keepdims=True)
    ss = jnp.sum(h * h, axis=0, keepdims=True)
    pad = jnp.zeros((8 - 2, h.shape[1]), jnp.float32)
    return jnp.concatenate([s, ss, pad], axis=0)


# ----------------------------- kernels -----------------------------

def _linear_stats_kernel(x_ref, w_ref, h_ref, stats_ref):
    # Layer-1 Linear.  Bias b1 intentionally dropped: it is exactly cancelled by the
    # mean subtraction of the following training-mode BatchNorm.
    h = jnp.dot(x_ref[...], w_ref[...], preferred_element_type=jnp.float32)
    stats_ref[...] = _col_stats_block(h)
    h_ref[...] = h.astype(h_ref.dtype)


def _bn_act_linear_stats_kernel(h_ref, sc_ref, sh_ref, w_ref, o_ref, stats_ref,
                                *, tile_n, n_valid):
    # BN folded to one FMA + LeakyReLU (f32), then layer-2 Linear (bf16 MXU) + h2 stats.
    a = _leaky_relu(h_ref[...] * sc_ref[...] + sh_ref[...])
    if n_valid % tile_n != 0:
        # Zero batch-padding rows so they cannot pollute layer-2 BN statistics.
        row = jax.lax.broadcasted_iota(jnp.int32, a.shape, 0) + pl.program_id(0) * tile_n
        a = jnp.where(row < n_valid, a, 0.0)
    h2 = jnp.dot(a.astype(w_ref.dtype), w_ref[...], preferred_element_type=jnp.float32)
    stats_ref[...] = _col_stats_block(h2)
    o_ref[...] = h2.astype(o_ref.dtype)


def _bn_act_linear_bias_kernel(h_ref, sc_ref, sh_ref, w_ref, b_ref, o_ref):
    a = _leaky_relu(h_ref[...] * sc_ref[...] + sh_ref[...])
    out = jnp.dot(a.astype(w_ref.dtype), w_ref[...], preferred_element_type=jnp.float32)
    o_ref[...] = (out + b_ref[...]).astype(o_ref.dtype)


# ----------------------------- wrapper -----------------------------

def _mosaic_params(block_bytes):
    # Double-buffered pipeline blocks + slack; never below the 32 MiB scoped default,
    # capped at 48 MiB so it also fits v7x's 64 MiB physical VMEM per TensorCore.
    need = 2 * int(block_bytes) + (2 << 20)
    return pltpu.CompilerParams(
        dimension_semantics=("parallel",),   # no cross-tile carries -> megacore-friendly
        vmem_limit_bytes=int(min(max(need, 32 << 20), 48 << 20)))


def _scale_shift(stats, gamma, beta, n):
    """Reduce per-tile (sum, sumsq) partials into folded BN scale/shift, each (1, H)."""
    st = stats.reshape(-1, 8, stats.shape[-1])
    s = jnp.sum(st[:, 0, :], axis=0)
    ss = jnp.sum(st[:, 1, :], axis=0)
    mean = s / n
    var = jnp.maximum(ss / n - mean * mean, 0.0)      # single-pass biased variance
    scale = gamma * jax.lax.rsqrt(var + BN_EPS)       # (1, H)
    shift = beta - mean * scale                       # (1, H)
    return scale, shift


@jax.jit
def mlpv2_forward(x, params):
    """x: (N, input_dim) f32; params from init_params. Returns (N, out_dim) f32."""
    n, input_dim = x.shape
    hidden_dim = params["w1"].shape[1]
    out_dim = params["w3"].shape[1]

    din_p = _round_up(input_dim, LANE)
    hid_p = _round_up(hidden_dim, LANE)
    dout_p = _round_up(out_dim, LANE)

    tile_n = min(TILE_N_MAX, _round_up(n, ROW_ALIGN))
    n_pad = _round_up(n, tile_n)
    num_tiles = n_pad // tile_n

    # Lane-dense zero padding; weights & activations in bf16 for full-rate MXU.
    xp = _pad2d(x, n_pad, din_p).astype(jnp.bfloat16)
    w1 = _pad2d(params["w1"], din_p, hid_p).astype(jnp.bfloat16)
    w2 = _pad2d(params["w2"], hid_p, hid_p).astype(jnp.bfloat16)
    w3 = _pad2d(params["w3"], hid_p, dout_p).astype(jnp.bfloat16)
    g1 = _pad2d(params["g1"], 1, hid_p)
    be1 = _pad2d(params["be1"], 1, hid_p)
    g2 = _pad2d(params["g2"], 1, hid_p)
    be2 = _pad2d(params["be2"], 1, hid_p)
    b3 = _pad2d(params["b3"], 1, dout_p)
    # b1 / b2 are NOT passed to the kernels: a bias before training-mode BN is a no-op.

    def row_spec(cols):            # per-tile blocks over the batch axis
        return pl.BlockSpec((tile_n, cols), lambda i: (i, 0))

    def full_spec(rows, cols):     # VMEM-resident across grid steps (constant index map)
        return pl.BlockSpec((rows, cols), lambda i: (0, 0))

    stats_spec = pl.BlockSpec((8, hid_p), lambda i: (i, 0))
    stats_shape = jax.ShapeDtypeStruct((num_tiles * 8, hid_p), jnp.float32)
    act_shape = jax.ShapeDtypeStruct((n_pad, hid_p), jnp.bfloat16)

    # ---- layer 1: Linear (+ per-tile BN stats of h1) ----
    blk1 = tile_n * din_p * 2 + din_p * hid_p * 2 + tile_n * hid_p * 2 + 8 * hid_p * 4
    h1, st1 = pl.pallas_call(
        _linear_stats_kernel,
        grid=(num_tiles,),
        in_specs=[row_spec(din_p), full_spec(din_p, hid_p)],
        out_specs=[row_spec(hid_p), stats_spec],
        out_shape=[act_shape, stats_shape],
        compiler_params=_mosaic_params(blk1),
        cost_estimate=pl.CostEstimate(
            flops=2 * n_pad * din_p * hid_p, transcendentals=0,
            bytes_accessed=n_pad * din_p * 2 + din_p * hid_p * 2
            + n_pad * hid_p * 2 + num_tiles * 8 * hid_p * 4),
    )(xp, w1)
    sc1, sh1 = _scale_shift(st1, g1, be1, n)

    # ---- layer 2: BN + LeakyReLU + Linear (+ per-tile BN stats of h2) ----
    blk2 = 2 * tile_n * hid_p * 2 + hid_p * hid_p * 2 + 2 * hid_p * 4 + 8 * hid_p * 4
    k2 = functools.partial(_bn_act_linear_stats_kernel, tile_n=tile_n, n_valid=n)
    h2, st2 = pl.pallas_call(
        k2,
        grid=(num_tiles,),
        in_specs=[row_spec(hid_p), full_spec(1, hid_p), full_spec(1, hid_p),
                  full_spec(hid_p, hid_p)],
        out_specs=[row_spec(hid_p), stats_spec],
        out_shape=[act_shape, stats_shape],
        compiler_params=_mosaic_params(blk2),
        cost_estimate=pl.CostEstimate(
            flops=2 * n_pad * hid_p * hid_p + 6 * n_pad * hid_p, transcendentals=0,
            bytes_accessed=2 * n_pad * hid_p * 2 + hid_p * hid_p * 2
            + 2 * hid_p * 4 + num_tiles * 8 * hid_p * 4),
    )(h1, sc1, sh1, w2)
    sc2, sh2 = _scale_shift(st2, g2, be2, n)

    # ---- output layer: BN + LeakyReLU + Linear + bias ----
    blk3 = (tile_n * hid_p * 2 + hid_p * dout_p * 2 + (2 * hid_p + dout_p) * 4
            + tile_n * dout_p * 4)
    out = pl.pallas_call(
        _bn_act_linear_bias_kernel,
        grid=(num_tiles,),
        in_specs=[row_spec(hid_p), full_spec(1, hid_p), full_spec(1, hid_p),
                  full_spec(hid_p, dout_p), full_spec(1, dout_p)],
        out_specs=row_spec(dout_p),
        out_shape=jax.ShapeDtypeStruct((n_pad, dout_p), x.dtype),
        compiler_params=_mosaic_params(blk3),
        cost_estimate=pl.CostEstimate(
            flops=2 * n_pad * hid_p * dout_p + 4 * n_pad * hid_p, transcendentals=0,
            bytes_accessed=n_pad * hid_p * 2 + hid_p * dout_p * 2 + n_pad * dout_p * 4),
    )(h2, sc2, sh2, w3, b3)

    return out[:n, :out_dim]


# ----------------------------- params & reference -----------------------------

def init_params(key, input_dim, hidden_dim, out_dim):
    """Deterministic synthetic params mirroring torch defaults. Weights stored (in, out)."""
    ks = jax.random.split(key, 6)
    s1 = 1.0 / jnp.sqrt(input_dim)
    s2 = 1.0 / jnp.sqrt(hidden_dim)
    return {
        "w1": jax.random.uniform(ks[0], (input_dim, hidden_dim), jnp.float32, -s1, s1),
        "b1": jax.random.uniform(ks[1], (1, hidden_dim), jnp.float32, -s1, s1),
        "g1": jnp.ones((1, hidden_dim), jnp.float32),    # BN weight init = 1
        "be1": jnp.zeros((1, hidden_dim), jnp.float32),  # BN bias init = 0
        "w2": jax.random.uniform(ks[2], (hidden_dim, hidden_dim), jnp.float32, -s2, s2),
        "b2": jax.random.uniform(ks[3], (1, hidden_dim), jnp.float32, -s2, s2),
        "g2": jnp.ones((1, hidden_dim), jnp.float32),
        "be2": jnp.zeros((1, hidden_dim), jnp.float32),
        "w3": jax.random.uniform(ks[4], (hidden_dim, out_dim), jnp.float32, -s2, s2),
        "b3": jax.random.uniform(ks[5], (1, out_dim), jnp.float32, -s2, s2),
    }


def mlpv2_reference(x, p):
    """Pure-JAX f32 replica of MLPV2.forward (training-mode BatchNorm1d), incl. b1/b2."""
    def bn_lrelu(h, g, b):
        mu = jnp.mean(h, axis=0, keepdims=True)
        var = jnp.mean((h - mu) ** 2, axis=0, keepdims=True)   # biased (training-mode)
        hn = (h - mu) * jax.lax.rsqrt(var + BN_EPS) * g + b
        return jnp.where(hn >= 0, hn, LRELU_SLOPE * hn)
    h1 = bn_lrelu(x @ p["w1"] + p["b1"], p["g1"], p["be1"])
    h2 = bn_lrelu(h1 @ p["w2"] + p["b2"], p["g2"], p["be2"])
    return h2 @ p["w3"] + p["b3"]


if __name__ == "__main__":
    key = jax.random.PRNGKey(0)
    kx, kp = jax.random.split(key)

    batch, input_dim, hidden_dim, out_dim = 8, 32, 32, 16
    x = jax.random.normal(kx, (batch, input_dim), jnp.float32)
    params = init_params(kp, input_dim, hidden_dim, out_dim)

    y = jax.block_until_ready(mlpv2_forward(x, params))
    y_ref = mlpv2_reference(x, params)

    assert y.shape == (batch, out_dim)
    # bf16 MXU inputs + bf16-stored intermediates -> looser tolerance vs the f32 reference
    # (also confirms dropping the pre-BN biases is exact up to that precision).
    assert jnp.allclose(y, y_ref, atol=5e-2, rtol=5e-2), (
        "mismatch vs reference: max abs diff "
        f"{float(jnp.max(jnp.abs(y - y_ref))):.4e}")
    print("KERNEL_OK")
</pallas_src>

<mosaic_0001>
module attributes {stable_mosaic.version = 11 : i64} {
  func.func @_linear_stats_kernel(%arg0: i32, %arg1: memref<16x128xbf16, #tpu.memory_space<vmem>>, %arg2: memref<128x128xbf16, #tpu.memory_space<vmem>>, %arg3: memref<16x128xbf16, #tpu.memory_space<vmem>>, %arg4: memref<8x128xf32, #tpu.memory_space<vmem>>) attributes {dimension_semantics = [#tpu.dimension_semantics<parallel>], iteration_bounds = array<i64: 1>, scalar_prefetch = 0 : i64, scratch_operands = 0 : i64, tpu.core_type = #tpu.core_type<tc>, window_params = [{transform_indices = @transform_0, window_bounds = array<i64: 16, 128>}, {pipeline_mode = #tpu.pipeline_mode<synchronous>, transform_indices = @transform_1, window_bounds = array<i64: 128, 128>}, {transform_indices = @transform_2, window_bounds = array<i64: 16, 128>}, {transform_indices = @transform_3, window_bounds = array<i64: 8, 128>}]} {
    %c0 = arith.constant 0 : index
    %c0_0 = arith.constant 0 : index
    %0 = vector.load %arg1[%c0, %c0_0] : memref<16x128xbf16, #tpu.memory_space<vmem>>, vector<16x128xbf16>
    %c0_1 = arith.constant 0 : index
    %c0_2 = arith.constant 0 : index
    %1 = vector.load %arg2[%c0_1, %c0_2] : memref<128x128xbf16, #tpu.memory_space<vmem>>, vector<128x128xbf16>
    %cst = arith.constant dense<0.000000e+00> : vector<16x128xf32>
    %2 = tpu.matmul %0, %1, %cst {dimension_numbers = #tpu.dot_dimension_numbers<[1], [0], [0], [1], [0, 0, 1, 1], [], []>} : vector<16x128xbf16>, vector<128x128xbf16>, vector<16x128xf32> -> vector<16x128xf32>
    %cst_3 = arith.constant dense<0.000000e+00> : vector<128xf32>
    %3 = vector.multi_reduction <add>, %2, %cst_3 [0] : vector<16x128xf32> to vector<128xf32>
    %4 = vector.shape_cast %3 : vector<128xf32> to vector<1x128xf32>
    %5 = arith.mulf %2, %2 : vector<16x128xf32>
    %cst_4 = arith.constant dense<0.000000e+00> : vector<128xf32>
    %6 = vector.multi_reduction <add>, %5, %cst_4 [0] : vector<16x128xf32> to vector<128xf32>
    %7 = vector.shape_cast %6 : vector<128xf32> to vector<1x128xf32>
    %cst_5 = arith.constant 0.000000e+00 : f32
    %8 = vector.broadcast %cst_5 : f32 to vector<6x128xf32>
    %9 = tpu.concatenate %4, %7, %8 in 0 : vector<1x128xf32>, vector<1x128xf32>, vector<6x128xf32> -> vector<8x128xf32>
    %c0_6 = arith.constant 0 : index
    %c0_7 = arith.constant 0 : index
    %10 = vector.load %arg4[%c0_6, %c0_7] : memref<8x128xf32, #tpu.memory_space<vmem>>, vector<8x128xf32>
    tpu.vector_store %arg4[%c0_6, %c0_7], %9 {strides = array<i32>} : memref<8x128xf32, #tpu.memory_space<vmem>>, vector<8x128xf32>,
    %11 = arith.truncf %2 : vector<16x128xf32> to vector<16x128xbf16>
    %c0_8 = arith.constant 0 : index
    %c0_9 = arith.constant 0 : index
    %12 = vector.load %arg3[%c0_8, %c0_9] : memref<16x128xbf16, #tpu.memory_space<vmem>>, vector<16x128xbf16>
    tpu.vector_store %arg3[%c0_8, %c0_9], %11 {strides = array<i32>} : memref<16x128xbf16, #tpu.memory_space<vmem>>, vector<16x128xbf16>,
    return
  }
  func.func @transform_0(%arg0: i32) -> (i32, i32) {
    %c0_i32 = arith.constant 0 : i32
    %c0_i32_0 = arith.constant 0 : i32
    return %arg0, %c0_i32 : i32, i32
  }
  func.func @transform_1(%arg0: i32) -> (i32, i32) {
    %c0_i32 = arith.constant 0 : i32
    %c0_i32_0 = arith.constant 0 : i32
    %c0_i32_1 = arith.constant 0 : i32
    return %c0_i32, %c0_i32_0 : i32, i32
  }
  func.func @transform_2(%arg0: i32) -> (i32, i32) {
    %c0_i32 = arith.constant 0 : i32
    %c0_i32_0 = arith.constant 0 : i32
    return %arg0, %c0_i32 : i32, i32
  }
  func.func @transform_3(%arg0: i32) -> (i32, i32) {
    %c0_i32 = arith.constant 0 : i32
    %c0_i32_0 = arith.constant 0 : i32
    return %arg0, %c0_i32 : i32, i32
  }
}

module attributes {stable_mosaic.version = 11 : i64} {
  func.func @_bn_act_linear_stats_kernel(%arg0: i32, %arg1: memref<16x128xbf16, #tpu.memory_space<vmem>>, %arg2: memref<1x128xf32, #tpu.memory_space<vmem>>, %arg3: memref<1x128xf32, #tpu.memory_space<vmem>>, %arg4: memref<128x128xbf16, #tpu.memory_space<vmem>>, %arg5: memref<16x128xbf16, #tpu.memory_space<vmem>>, %arg6: memref<8x128xf32, #tpu.memory_space<vmem>>) attributes {dimension_semantics = [#tpu.dimension_semantics<parallel>], iteration_bounds = array<i64: 1>, scalar_prefetch = 0 : i64, scratch_operands = 0 : i64, tpu.core_type = #tpu.core_type<tc>, window_params = [{transform_indices = @transform_0, window_bounds = array<i64: 16, 128>}, {pipeline_mode = #tpu.pipeline_mode<synchronous>, transform_indices = @transform_1, window_bounds = array<i64: 1, 128>}, {pipeline_mode = #tpu.pipeline_mode<synchronous>, transform_indices = @transform_2, window_bounds = array<i64: 1, 128>}, {pipeline_mode = #tpu.pipeline_mode<synchronous>, transform_indices = @transform_3, window_bounds = array<i64: 128, 128>}, {transform_indices = @transform_4, window_bounds = array<i64: 16, 128>}, {transform_indices = @transform_5, window_bounds = array<i64: 8, 128>}]} {
    %c0 = arith.constant 0 : index
    %c0_0 = arith.constant 0 : index
    %0 = vector.load %arg1[%c0, %c0_0] : memref<16x128xbf16, #tpu.memory_space<vmem>>, vector<16x128xbf16>
    %c0_1 = arith.constant 0 : index
    %c0_2 = arith.constant 0 : index
    %1 = vector.load %arg2[%c0_1, %c0_2] : memref<1x128xf32, #tpu.memory_space<vmem>>, vector<1x128xf32>
    %2 = arith.extf %0 : vector<16x128xbf16> to vector<16x128xf32>
    %3 = vector.broadcast %1 : vector<1x128xf32> to vector<16x128xf32>
    %4 = arith.mulf %2, %3 : vector<16x128xf32>
    %c0_3 = arith.constant 0 : index
    %c0_4 = arith.constant 0 : index
    %5 = vector.load %arg3[%c0_3, %c0_4] : memref<1x128xf32, #tpu.memory_space<vmem>>, vector<1x128xf32>
    %6 = vector.broadcast %5 : vector<1x128xf32> to vector<16x128xf32>
    %7 = arith.addf %4, %6 : vector<16x128xf32>
    %cst = arith.constant 0.000000e+00 : f32
    %8 = vector.broadcast %cst : f32 to vector<16x128xf32>
    %9 = arith.cmpf oge, %7, %8 : vector<16x128xf32>
    %cst_5 = arith.constant 1.000000e-01 : f32
    %10 = vector.broadcast %cst_5 : f32 to vector<16x128xf32>
    %11 = arith.mulf %10, %7 : vector<16x128xf32>
    %12 = arith.select %9, %7, %11 : vector<16x128xi1>, vector<16x128xf32>
    %13 = tpu.iota {dimensions = array<i32: 0>} : vector<16x128xi32>
    %c16_i32 = arith.constant 16 : i32
    %14 = arith.muli %arg0, %c16_i32 : i32
    %15 = vector.broadcast %14 : i32 to vector<16x128xi32>
    %16 = arith.addi %13, %15 : vector<16x128xi32>
    %c8_i32 = arith.constant 8 : i32
    %17 = vector.broadcast %c8_i32 : i32 to vector<16x128xi32>
    %18 = arith.cmpi slt, %16, %17 : vector<16x128xi32>
    %cst_6 = arith.constant 0.000000e+00 : f32
    %19 = vector.broadcast %cst_6 : f32 to vector<16x128xf32>
    %20 = arith.select %18, %12, %19 : vector<16x128xi1>, vector<16x128xf32>
    %21 = arith.truncf %20 : vector<16x128xf32> to vector<16x128xbf16>
    %c0_7 = arith.constant 0 : index
    %c0_8 = arith.constant 0 : index
    %22 = vector.load %arg4[%c0_7, %c0_8] : memref<128x128xbf16, #tpu.memory_space<vmem>>, vector<128x128xbf16>
    %cst_9 = arith.constant dense<0.000000e+00> : vector<16x128xf32>
    %23 = tpu.matmul %21, %22, %cst_9 {dimension_numbers = #tpu.dot_dimension_numbers<[1], [0], [0], [1], [0, 0, 1, 1], [], []>} : vector<16x128xbf16>, vector<128x128xbf16>, vector<16x128xf32> -> vector<16x128xf32>
    %cst_10 = arith.constant dense<0.000000e+00> : vector<128xf32>
    %24 = vector.multi_reduction <add>, %23, %cst_10 [0] : vector<16x128xf32> to vector<128xf32>
    %25 = vector.shape_cast %24 : vector<128xf32> to vector<1x128xf32>
    %26 = arith.mulf %23, %23 : vector<16x128xf32>
    %cst_11 = arith.constant dense<0.000000e+00> : vector<128xf32>
    %27 = vector.multi_reduction <add>, %26, %cst_11 [0] : vector<16x128xf32> to vector<128xf32>
    %28 = vector.shape_cast %27 : vector<128xf32> to vector<1x128xf32>
    %cst_12 = arith.constant 0.000000e+00 : f32
    %29 = vector.broadcast %cst_12 : f32 to vector<6x128xf32>
    %30 = tpu.concatenate %25, %28, %29 in 0 : vector<1x128xf32>, vector<1x128xf32>, vector<6x128xf32> -> vector<8x128xf32>
    %c0_13 = arith.constant 0 : index
    %c0_14 = arith.constant 0 : index
    %31 = vector.load %arg6[%c0_13, %c0_14] : memref<8x128xf32, #tpu.memory_space<vmem>>, vector<8x128xf32>
    tpu.vector_store %arg6[%c0_13, %c0_14], %30 {strides = array<i32>} : memref<8x128xf32, #tpu.memory_space<vmem>>, vector<8x128xf32>,
    %32 = arith.truncf %23 : vector<16x128xf32> to vector<16x128xbf16>
    %c0_15 = arith.constant 0 : index
    %c0_16 = arith.constant 0 : index
    %33 = vector.load %arg5[%c0_15, %c0_16] : memref<16x128xbf16, #tpu.memory_space<vmem>>, vector<16x128xbf16>
    tpu.vector_store %arg5[%c0_15, %c0_16], %32 {strides = array<i32>} : memref<16x128xbf16, #tpu.memory_space<vmem>>, vector<16x128xbf16>,
    return
  }
  func.func @transform_0(%arg0: i32) -> (i32, i32) {
    %c0_i32 = arith.constant 0 : i32
    %c0_i32_0 = arith.constant 0 : i32
    return %arg0, %c0_i32 : i32, i32
  }
  func.func @transform_1(%arg0: i32) -> (i32, i32) {
    %c0_i32 = arith.constant 0 : i32
    %c0_i32_0 = arith.constant 0 : i32
    %c0_i32_1 = arith.constant 0 : i32
    return %c0_i32, %c0_i32_0 : i32, i32
  }
  func.func @transform_2(%arg0: i32) -> (i32, i32) {
    %c0_i32 = arith.constant 0 : i32
    %c0_i32_0 = arith.constant 0 : i32
    %c0_i32_1 = arith.constant 0 : i32
    return %c0_i32, %c0_i32_0 : i32, i32
  }
  func.func @transform_3(%arg0: i32) -> (i32, i32) {
    %c0_i32 = arith.constant 0 : i32
    %c0_i32_0 = arith.constant 0 : i32
    %c0_i32_1 = arith.constant 0 : i32
    return %c0_i32, %c0_i32_0 : i32, i32
  }
  func.func @transform_4(%arg0: i32) -> (i32, i32) {
    %c0_i32 = arith.constant 0 : i32
    %c0_i32_0 = arith.constant 0 : i32
    return %arg0, %c0_i32 : i32, i32
  }
  func.func @transform_5(%arg0: i32) -> (i32, i32) {
    %c0_i32 = arith.constant 0 : i32
    %c0_i32_0 = arith.constant 0 : i32
    return %arg0, %c0_i32 : i32, i32
  }
}

module attributes {stable_mosaic.version = 11 : i64} {
  func.func @_bn_act_linear_bias_kernel(%arg0: i32, %arg1: memref<16x128xbf16, #tpu.memory_space<vmem>>, %arg2: memref<1x128xf32, #tpu.memory_space<vmem>>, %arg3: memref<1x128xf32, #tpu.memory_space<vmem>>, %arg4: memref<128x128xbf16, #tpu.memory_space<vmem>>, %arg5: memref<1x128xf32, #tpu.memory_space<vmem>>, %arg6: memref<16x128xf32, #tpu.memory_space<vmem>>) attributes {dimension_semantics = [#tpu.dimension_semantics<parallel>], iteration_bounds = array<i64: 1>, scalar_prefetch = 0 : i64, scratch_operands = 0 : i64, tpu.core_type = #tpu.core_type<tc>, window_params = [{transform_indices = @transform_0, window_bounds = array<i64: 16, 128>}, {pipeline_mode = #tpu.pipeline_mode<synchronous>, transform_indices = @transform_1, window_bounds = array<i64: 1, 128>}, {pipeline_mode = #tpu.pipeline_mode<synchronous>, transform_indices = @transform_2, window_bounds = array<i64: 1, 128>}, {pipeline_mode = #tpu.pipeline_mode<synchronous>, transform_indices = @transform_3, window_bounds = array<i64: 128, 128>}, {pipeline_mode = #tpu.pipeline_mode<synchronous>, transform_indices = @transform_4, window_bounds = array<i64: 1, 128>}, {transform_indices = @transform_5, window_bounds = array<i64: 16, 128>}]} {
    %c0 = arith.constant 0 : index
    %c0_0 = arith.constant 0 : index
    %0 = vector.load %arg1[%c0, %c0_0] : memref<16x128xbf16, #tpu.memory_space<vmem>>, vector<16x128xbf16>
    %c0_1 = arith.constant 0 : index
    %c0_2 = arith.constant 0 : index
    %1 = vector.load %arg2[%c0_1, %c0_2] : memref<1x128xf32, #tpu.memory_space<vmem>>, vector<1x128xf32>
    %2 = arith.extf %0 : vector<16x128xbf16> to vector<16x128xf32>
    %3 = vector.broadcast %1 : vector<1x128xf32> to vector<16x128xf32>
    %4 = arith.mulf %2, %3 : vector<16x128xf32>
    %c0_3 = arith.constant 0 : index
    %c0_4 = arith.constant 0 : index
    %5 = vector.load %arg3[%c0_3, %c0_4] : memref<1x128xf32, #tpu.memory_space<vmem>>, vector<1x128xf32>
    %6 = vector.broadcast %5 : vector<1x128xf32> to vector<16x128xf32>
    %7 = arith.addf %4, %6 : vector<16x128xf32>
    %cst = arith.constant 0.000000e+00 : f32
    %8 = vector.broadcast %cst : f32 to vector<16x128xf32>
    %9 = arith.cmpf oge, %7, %8 : vector<16x128xf32>
    %cst_5 = arith.constant 1.000000e-01 : f32
    %10 = vector.broadcast %cst_5 : f32 to vector<16x128xf32>
    %11 = arith.mulf %10, %7 : vector<16x128xf32>
    %12 = arith.select %9, %7, %11 : vector<16x128xi1>, vector<16x128xf32>
    %13 = arith.truncf %12 : vector<16x128xf32> to vector<16x128xbf16>
    %c0_6 = arith.constant 0 : index
    %c0_7 = arith.constant 0 : index
    %14 = vector.load %arg4[%c0_6, %c0_7] : memref<128x128xbf16, #tpu.memory_space<vmem>>, vector<128x128xbf16>
    %cst_8 = arith.constant dense<0.000000e+00> : vector<16x128xf32>
    %15 = tpu.matmul %13, %14, %cst_8 {dimension_numbers = #tpu.dot_dimension_numbers<[1], [0], [0], [1], [0, 0, 1, 1], [], []>} : vector<16x128xbf16>, vector<128x128xbf16>, vector<16x128xf32> -> vector<16x128xf32>
    %c0_9 = arith.constant 0 : index
    %c0_10 = arith.constant 0 : index
    %16 = vector.load %arg5[%c0_9, %c0_10] : memref<1x128xf32, #tpu.memory_space<vmem>>, vector<1x128xf32>
    %17 = vector.broadcast %16 : vector<1x128xf32> to vector<16x128xf32>
    %18 = arith.addf %15, %17 : vector<16x128xf32>
    %c0_11 = arith.constant 0 : index
    %c0_12 = arith.constant 0 : index
    %19 = vector.load %arg6[%c0_11, %c0_12] : memref<16x128xf32, #tpu.memory_space<vmem>>, vector<16x128xf32>
    tpu.vector_store %arg6[%c0_11, %c0_12], %18 {strides = array<i32>} : memref<16x128xf32, #tpu.memory_space<vmem>>, vector<16x128xf32>,
    return
  }
  func.func @transform_0(%arg0: i32) -> (i32, i32) {
    %c0_i32 = arith.constant 0 : i32
    %c0_i32_0 = arith.constant 0 : i32
    return %arg0, %c0_i32 : i32, i32
  }
  func.func @transform_1(%arg0: i32) -> (i32, i32) {
    %c0_i32 = arith.constant 0 : i32
    %c0_i32_0 = arith.constant 0 : i32
    %c0_i32_1 = arith.constant 0 : i32
    return %c0_i32, %c0_i32_0 : i32, i32
  }
  func.func @transform_2(%arg0: i32) -> (i32, i32) {
    %c0_i32 = arith.constant 0 : i32
    %c0_i32_0 = arith.constant 0 : i32
    %c0_i32_1 = arith.constant 0 : i32
    return %c0_i32, %c0_i32_0 : i32, i32
  }
  func.func @transform_3(%arg0: i32) -> (i32, i32) {
    %c0_i32 = arith.constant 0 : i32
    %c0_i32_0 = arith.constant 0 : i32
    %c0_i32_1 = arith.constant 0 : i32
    return %c0_i32, %c0_i32_0 : i32, i32
  }
  func.func @transform_4(%arg0: i32) -> (i32, i32) {
    %c0_i32 = arith.constant 0 : i32
    %c0_i32_0 = arith.constant 0 : i32
    %c0_i32_1 = arith.constant 0 : i32
    return %c0_i32, %c0_i32_0 : i32, i32
  }
  func.func @transform_5(%arg0: i32) -> (i32, i32) {
    %c0_i32 = arith.constant 0 : i32
    %c0_i32_0 = arith.constant 0 : i32
    return %arg0, %c0_i32 : i32, i32
  }
}

</mosaic_0001>

<bundles_post_ra>
// kernel: mlpv2_forward.4
= control target key start
LH: loop header
LB: loop body
LE: loop exit
PB: predicated region body
PF: predicated region fallthrough
CT: control target
= control target key end

     0   :  { %v262_v0 = vmov 0.0   ;;  %vm263_vm0 = vmmov 0   ;;  %vm181_vm2 = vcmask 1040384   ;;  %vm183_vm3 = vcmask 1041408   ;;  %s333_s3 = inlined_call_operand.vmem [shape: bf16[128,128], index: 3, kind: input, shape index: {}]   ;;  %s334_s0 = inlined_call_operand.vmem [shape: bf16[16,128], index: 0, kind: input, shape index: {}]   ;;  %s335_s1 = inlined_call_operand.vmem [shape: f32[1,128], index: 1, kind: input, shape index: {}]   ;;  %s336_s2 = inlined_call_operand.vmem [shape: f32[1,128], index: 2, kind: input, shape index: {}]   ;;  %s337_s4 = inlined_call_operand.vmem [shape: bf16[16,128], index: 4, kind: output, shape index: {0}]   ;;  %s338_s5 = inlined_call_operand.vmem [shape: f32[8,128], index: 5, kind: output, shape index: {1}]  }
   0x1   :  { %232 = vmatprep.subr.bf16.mxu0 %v262_v0  ;;  %v254_v1 = vld [vmem:[%s333_s3 + $0x38] sm:$0xff]   ;;  %248 = vmatprep.mubr.msk.bf16.mxu0 %vm263_vm0, %v262_v0  ;;  %v255_v2 = vld [vmem:[%s333_s3 + $0x30] sm:$0xff]   ;;  %v256_v3 = vld [vmem:[%s333_s3 + $0x28] sm:$0xff]  }
   0x2   :  { %233 = vmatpush3.bf16.msra.mxu0 %v254_v1  ;;  %v20_v4 = vld [vmem:[%s334_s0] sm:$0xf]  ;;  %v258_v8 = vld [vmem:[%s333_s3 + $0x18] sm:$0xff]   ;;  %v259_v11 = vld [vmem:[%s333_s3 + $0x10] sm:$0xff]  }
   0x3   :  { %234 = vmatprep.subr.bf16.mxu0 %v262_v0  ;;  %v257_v5 = vld [vmem:[%s333_s3 + $0x20] sm:$0xff]   ;;  %v23_v6 = vunpack.c.l.bf16 %v20_v4  ;;  %v260_v13 = vld [vmem:[%s333_s3 + $0x8] sm:$0xff]  }
   0x4   :  { %v204_v7 = vld [vmem:[%s335_s1] ss:$0 sm:$0xff] }
   0x5   :  { %v31_v9 = vmul.f32 %v204_v7, %v23_v6  ;;  %v205_v10 = vld [vmem:[%s336_s2] ss:$0 sm:$0xff] }
   0x6   :  { %235 = vmatpush3.bf16.msra.mxu0 %v255_v2  ;;  %v261_v15 = vld [vmem:[%s333_s3] sm:$0xff]  }
   0x7   :  { %236 = vmatprep.subr.bf16.mxu0 %v262_v0  ;;  %v40_v12 = vadd.f32 %v205_v10, %v31_v9 }
   0x9   :  { %v44_v14 = vmul.f32 0.1, %v40_v12  ;;  %vm42_vm1 = vcmp.ge.f32.partialorder %v40_v12, 0.0 }
   0xa   :  { %237 = vmatpush3.bf16.msra.mxu0 %v256_v3 }
   0xb   :  { %238 = vmatprep.subr.bf16.mxu0 %v262_v0  ;;  %v46_v16 = vsel %vm42_vm1, %v40_v12, %v44_v14 }
   0xc   :  { %v59_v17 = vpack.c.bf16 %v262_v0, %v46_v16 }
   0xe   :  { %239 = vmatpush3.bf16.msra.mxu0 %v257_v5 }
   0xf   :  { %240 = vmatprep.subr.bf16.mxu0 %v262_v0 }
  0x12   :  { %241 = vmatpush3.bf16.msra.mxu0 %v258_v8 }
  0x13   :  { %242 = vmatprep.subr.bf16.mxu0 %v262_v0 }
  0x16   :  { %243 = vmatpush3.bf16.msra.mxu0 %v259_v11 }
  0x17   :  { %244 = vmatprep.subr.bf16.mxu0 %v262_v0 }
  0x1a   :  { %245 = vmatpush3.bf16.msra.mxu0 %v260_v13 }
  0x1b   :  { %246 = vmatprep.subr.bf16.mxu0 %v262_v0 }
  0x1e   :  { %247 = vmatpush3.bf16.msra.mxu0 %v261_v15 }
  0x21   :  { %249 = vmatmul.mubr.bf16.vlgmr.msra.gmra.mxu0 %v59_v17 }
  0xe1   :  { %v158_v18 = vpop.f32.mrf.mxu0 }
  0xe2   :  { %v172_v21 = vmul.f32 %v158_v18, %v158_v18 }
  0xe3   :  { %v250_v19 = vpop.f32.mrf.mxu0 }
  0xe5   :  { %v161_v20 = vpop.f32.mrf.mxu0 }
  0xe6   :  { %v165_v22 = vadd.f32 %v161_v20, %v158_v18  ;;  %v173_v23 = vmul.f32 %v161_v20, %v161_v20  ;;  %v221_v24 = vpack.c.bf16 %v161_v20, %v158_v18 }
  0xe7   :  { %v251_v25 = vpop.f32.mrf.mxu0 }
  0xe8   :  { %v166_v26 = vrot.slane %v165_v22, 4  ;;  %v174_v27 = vadd.f32 %v173_v23, %v172_v21  ;;  %222 = vst [vmem:[%s337_s4] sm:$0xff] %v221_v24  }
  0xea   :  { %v167_v28 = vadd.f32 %v166_v26, %v165_v22  ;;  %v175_v29 = vrot.slane %v174_v27, 4 }
  0xec   :  { %v168_v30 = vrot.slane %v167_v28, 2  ;;  %v176_v31 = vadd.f32 %v175_v29, %v174_v27 }
  0xee   :  { %v169_v32 = vadd.f32 %v168_v30, %v167_v28  ;;  %v177_v33 = vrot.slane %v176_v31, 2 }
  0xf0   :  { %v170_v34 = vrot.slane %v169_v32, 1  ;;  %v178_v35 = vadd.f32 %v177_v33, %v176_v31 }
  0xf2   :  { %v179_v36 = vrot.slane %v178_v35, 1  ;;  %v171_v37 = vadd.f32 %v170_v34, %v169_v32 }
  0xf4   :  { %v180_v38 = vadd.f32 %v179_v36, %v178_v35 }
  0xf6   :  { %v182_v39 = vsel %vm181_vm2, %v171_v37, %v180_v38 }
  0xf7   :  { %v184_v40 = vsel %vm183_vm3, %v182_v39, 0.0 }
  0xf8   :  { %185 = vst [vmem:[%s338_s5] sm:$0xff] %v184_v40 }

// kernel: mlpv2_forward.3
= control target key start
LH: loop header
LB: loop body
LE: loop exit
PB: predicated region body
PF: predicated region fallthrough
CT: control target
= control target key end

     0   :  { %v224_v0 = vmov 0.0   ;;  %vm225_vm0 = vmmov 0   ;;  %vm143_vm1 = vcmask 1040384   ;;  %vm145_vm2 = vcmask 1041408   ;;  %s279_s1 = inlined_call_operand.vmem [shape: bf16[128,128], index: 1, kind: input, shape index: {}]   ;;  %s280_s0 = inlined_call_operand.vmem [shape: bf16[16,128], index: 0, kind: input, shape index: {}]   ;;  %s281_s2 = inlined_call_operand.vmem [shape: bf16[16,128], index: 2, kind: output, shape index: {0}]   ;;  %s282_s3 = inlined_call_operand.vmem [shape: f32[8,128], index: 3, kind: output, shape index: {1}]  }
   0x1   :  { %193 = vmatprep.subr.bf16.mxu0 %v224_v0  ;;  %v215_v1 = vld [vmem:[%s279_s1 + $0x38] sm:$0xff]   ;;  %209 = vmatprep.mubr.msk.bf16.mxu0 %vm225_vm0, %v224_v0  ;;  %v216_v2 = vld [vmem:[%s279_s1 + $0x30] sm:$0xff]   ;;  %v217_v3 = vld [vmem:[%s279_s1 + $0x28] sm:$0xff]  }
   0x2   :  { %194 = vmatpush3.bf16.msra.mxu0 %v215_v1  ;;  %v218_v4 = vld [vmem:[%s279_s1 + $0x20] sm:$0xff]   ;;  %v219_v5 = vld [vmem:[%s279_s1 + $0x18] sm:$0xff]   ;;  %v220_v6 = vld [vmem:[%s279_s1 + $0x10] sm:$0xff]  }
   0x3   :  { %195 = vmatprep.subr.bf16.mxu0 %v224_v0  ;;  %v221_v7 = vld [vmem:[%s279_s1 + $0x8] sm:$0xff]   ;;  %v222_v8 = vld [vmem:[%s279_s1] sm:$0xff]  }
   0x4   :  { %v223_v9 = vld [vmem:[%s280_s0] sm:$0xff]  }
   0x6   :  { %196 = vmatpush3.bf16.msra.mxu0 %v216_v2 }
   0x7   :  { %197 = vmatprep.subr.bf16.mxu0 %v224_v0 }
   0xa   :  { %198 = vmatpush3.bf16.msra.mxu0 %v217_v3 }
   0xb   :  { %199 = vmatprep.subr.bf16.mxu0 %v224_v0 }
   0xe   :  { %200 = vmatpush3.bf16.msra.mxu0 %v218_v4 }
   0xf   :  { %201 = vmatprep.subr.bf16.mxu0 %v224_v0 }
  0x12   :  { %202 = vmatpush3.bf16.msra.mxu0 %v219_v5 }
  0x13   :  { %203 = vmatprep.subr.bf16.mxu0 %v224_v0 }
  0x16   :  { %204 = vmatpush3.bf16.msra.mxu0 %v220_v6 }
  0x17   :  { %205 = vmatprep.subr.bf16.mxu0 %v224_v0 }
  0x1a   :  { %206 = vmatpush3.bf16.msra.mxu0 %v221_v7 }
  0x1b   :  { %207 = vmatprep.subr.bf16.mxu0 %v224_v0 }
  0x1e   :  { %208 = vmatpush3.bf16.msra.mxu0 %v222_v8 }
  0x21   :  { %210 = vmatmul.mubr.bf16.vlgmr.msra.gmra.mxu0 %v223_v9 }
  0xe1   :  { %v120_v10 = vpop.f32.mrf.mxu0 }
  0xe2   :  { %v134_v13 = vmul.f32 %v120_v10, %v120_v10 }
  0xe3   :  { %v211_v11 = vpop.f32.mrf.mxu0 }
  0xe5   :  { %v123_v12 = vpop.f32.mrf.mxu0 }
  0xe6   :  { %v127_v14 = vadd.f32 %v123_v12, %v120_v10  ;;  %v135_v15 = vmul.f32 %v123_v12, %v123_v12  ;;  %v182_v16 = vpack.c.bf16 %v123_v12, %v120_v10 }
  0xe7   :  { %v212_v17 = vpop.f32.mrf.mxu0 }
  0xe8   :  { %v128_v18 = vrot.slane %v127_v14, 4  ;;  %v136_v19 = vadd.f32 %v135_v15, %v134_v13  ;;  %183 = vst [vmem:[%s281_s2] sm:$0xff] %v182_v16  }
  0xea   :  { %v129_v20 = vadd.f32 %v128_v18, %v127_v14  ;;  %v137_v21 = vrot.slane %v136_v19, 4 }
  0xec   :  { %v130_v22 = vrot.slane %v129_v20, 2  ;;  %v138_v23 = vadd.f32 %v137_v21, %v136_v19 }
  0xee   :  { %v131_v24 = vadd.f32 %v130_v22, %v129_v20  ;;  %v139_v25 = vrot.slane %v138_v23, 2 }
  0xf0   :  { %v132_v26 = vrot.slane %v131_v24, 1  ;;  %v140_v27 = vadd.f32 %v139_v25, %v138_v23 }
  0xf2   :  { %v141_v28 = vrot.slane %v140_v27, 1  ;;  %v133_v29 = vadd.f32 %v132_v26, %v131_v24 }
  0xf4   :  { %v142_v30 = vadd.f32 %v141_v28, %v140_v27 }
  0xf6   :  { %v144_v31 = vsel %vm143_vm1, %v133_v29, %v142_v30 }
  0xf7   :  { %v146_v32 = vsel %vm145_vm2, %v144_v31, 0.0 }
  0xf8   :  { %147 = vst [vmem:[%s282_s3] sm:$0xff] %v146_v32 }

// kernel: mlpv2_forward.5
= control target key start
LH: loop header
LB: loop body
LE: loop exit
PB: predicated region body
PF: predicated region fallthrough
CT: control target
= control target key end

     0   :  { %v222_v0 = vmov 0.0   ;;  %vm223_vm0 = vmmov 0   ;;  %s296_s3 = inlined_call_operand.vmem [shape: bf16[128,128], index: 3, kind: input, shape index: {}]   ;;  %s297_s0 = inlined_call_operand.vmem [shape: bf16[16,128], index: 0, kind: input, shape index: {}]   ;;  %s298_s1 = inlined_call_operand.vmem [shape: f32[1,128], index: 1, kind: input, shape index: {}]   ;;  %s299_s2 = inlined_call_operand.vmem [shape: f32[1,128], index: 2, kind: input, shape index: {}]   ;;  %s300_s4 = inlined_call_operand.vmem [shape: f32[1,128], index: 4, kind: input, shape index: {}]   ;;  %s301_s5 = inlined_call_operand.vmem [shape: f32[16,128], index: 5, kind: output, shape index: {}]  }
   0x1   :  { %192 = vmatprep.subr.bf16.mxu0 %v222_v0  ;;  %v214_v1 = vld [vmem:[%s296_s3 + $0x38] sm:$0xff]   ;;  %208 = vmatprep.mubr.msk.bf16.mxu0 %vm223_vm0, %v222_v0  ;;  %v215_v2 = vld [vmem:[%s296_s3 + $0x30] sm:$0xff]   ;;  %v216_v3 = vld [vmem:[%s296_s3 + $0x28] sm:$0xff]  }
   0x2   :  { %193 = vmatpush3.bf16.msra.mxu0 %v214_v1  ;;  %v180_v4 = vld [vmem:[%s297_s0] sm:$0xff]   ;;  %v218_v9 = vld [vmem:[%s296_s3 + $0x18] sm:$0xff]   ;;  %v219_v13 = vld [vmem:[%s296_s3 + $0x10] sm:$0xff]  }
   0x3   :  { %194 = vmatprep.subr.bf16.mxu0 %v222_v0  ;;  %v217_v5 = vld [vmem:[%s296_s3 + $0x20] sm:$0xff]   ;;  %v181_v6 = vunpack.c.l.bf16 %v180_v4  ;;  %v182_v7 = vunpack.c.h.bf16 %v180_v4  ;;  %v220_v16 = vld [vmem:[%s296_s3 + $0x8] sm:$0xff]  }
   0x4   :  { %v168_v8 = vld [vmem:[%s298_s1] ss:$0 sm:$0xff] }
   0x5   :  { %v32_v10 = vmul.f32 %v181_v6, %v168_v8  ;;  %v33_v11 = vmul.f32 %v182_v7, %v168_v8  ;;  %v169_v12 = vld [vmem:[%s299_s2] ss:$0 sm:$0xff] }
   0x6   :  { %195 = vmatpush3.bf16.msra.mxu0 %v215_v2  ;;  %v221_v19 = vld [vmem:[%s296_s3] sm:$0xff]  }
   0x7   :  { %196 = vmatprep.subr.bf16.mxu0 %v222_v0  ;;  %v41_v14 = vadd.f32 %v169_v12, %v32_v10  ;;  %v42_v15 = vadd.f32 %v169_v12, %v33_v11  ;;  %v170_v23 = vld [vmem:[%s300_s4] ss:$0 sm:$0xff] }
   0x9   :  { %v45_v17 = vmul.f32 0.1, %v41_v14  ;;  %v46_v18 = vmul.f32 0.1, %v42_v15  ;;  %vm43_vm1 = vcmp.ge.f32.partialorder %v41_v14, 0.0  ;;  %vm44_vm2 = vcmp.ge.f32.partialorder %v42_v15, 0.0 }
   0xa   :  { %197 = vmatpush3.bf16.msra.mxu0 %v216_v3 }
   0xb   :  { %198 = vmatprep.subr.bf16.mxu0 %v222_v0  ;;  %v47_v20 = vsel %vm43_vm1, %v41_v14, %v45_v17  ;;  %v48_v21 = vsel %vm44_vm2, %v42_v15, %v46_v18 }
   0xc   :  { %v49_v22 = vpack.c.bf16 %v48_v21, %v47_v20 }
   0xe   :  { %199 = vmatpush3.bf16.msra.mxu0 %v217_v5 }
   0xf   :  { %200 = vmatprep.subr.bf16.mxu0 %v222_v0 }
  0x12   :  { %201 = vmatpush3.bf16.msra.mxu0 %v218_v9 }
  0x13   :  { %202 = vmatprep.subr.bf16.mxu0 %v222_v0 }
  0x16   :  { %203 = vmatpush3.bf16.msra.mxu0 %v219_v13 }
  0x17   :  { %204 = vmatprep.subr.bf16.mxu0 %v222_v0 }
  0x1a   :  { %205 = vmatpush3.bf16.msra.mxu0 %v220_v16 }
  0x1b   :  { %206 = vmatprep.subr.bf16.mxu0 %v222_v0 }
  0x1e   :  { %207 = vmatpush3.bf16.msra.mxu0 %v221_v19 }
  0x21   :  { %209 = vmatmul.mubr.bf16.vlgmr.msra.gmra.mxu0 %v49_v22 }
  0xe1   :  { %v155_v24 = vpop.f32.mrf.mxu0 }
  0xe2   :  { %v156_v25 = vadd.f32 %v170_v23, %v155_v24 }
  0xe3   :  { %v210_v26 = vpop.f32.mrf.mxu0 }
  0xe4   :  { %162 = vst [vmem:[%s301_s5] sm:$0xff] %v156_v25 }
  0xe5   :  { %v158_v27 = vpop.f32.mrf.mxu0 }
  0xe6   :  { %v159_v28 = vadd.f32 %v170_v23, %v158_v27 }
  0xe7   :  { %v211_v29 = vpop.f32.mrf.mxu0 }
  0xe8   :  { %163 = vst [vmem:[%s301_s5 + $0x8] sm:$0xff] %v159_v28 }

</bundles_post_ra>
